<compile_context>
chip_gen: v6e
topology: v6e:2x2x1
jax: 0.10.0
libtpu: 0.0.40
codegen_flags: <defaults>
</compile_context>

<pallas_src>
import math

import jax
import jax.numpy as jnp
import numpy as np
from jax.experimental import pallas as pl
from jax.experimental.pallas import tpu as pltpu


def _round_up(x, m):
    return (x + m - 1) // m * m


# ----------------------------------------------------------------------------
# Pallas kernel: per-residue matmul + bias, transposed (lane-dense) orientation.
#   w_ref : (1, Cout, Kd)   sub-kernel for this residue (small, resident)
#   c_ref : (1, Kd,  TM)    im2col columns, M on lanes (lane-dense loads)
#   b_ref : (Cout, 1)       bias, broadcast over lanes
#   o_ref : (1, Cout, TM)   output tile, M on lanes (unmasked stores)
# ----------------------------------------------------------------------------
def _grouped_matmul_kernel(w_ref, c_ref, b_ref, o_ref):
    acc = jnp.dot(w_ref[0], c_ref[0], preferred_element_type=jnp.float32)
    o_ref[0] = (acc + b_ref[...]).astype(o_ref.dtype)


def _grouped_matmul_pallas(w_t, cols_t, bias_col):
    """w_t: (R, Cout, Kd); cols_t: (R, Kd, Mp); bias_col: (Cout, 1) -> (R, Cout, Mp)."""
    R, Cout, Kd = w_t.shape
    _, _, Mp = cols_t.shape

    # Largest lane tile (multiple of 128 dividing Mp) that fits the VMEM budget
    # (double-buffered cols / out / w tiles).  Mp is always a multiple of 128.
    budget = 24 * 1024 * 1024
    tm = 128
    for cand in (4096, 2048, 1024, 512, 256, 128):
        if cand <= Mp and Mp % cand == 0 and 8 * (Kd * cand + Cout * cand + Cout * Kd) <= budget:
            tm = cand
            break

    flops = 2 * R * Cout * Kd * Mp
    bytes_accessed = 4 * (R * Cout * Kd + R * Kd * Mp + Cout + R * Cout * Mp)

    return pl.pallas_call(
        _grouped_matmul_kernel,
        out_shape=jax.ShapeDtypeStruct((R, Cout, Mp), jnp.float32),
        grid_spec=pltpu.PrefetchScalarGridSpec(
            num_scalar_prefetch=0,
            grid=(R, Mp // tm),
            in_specs=[
                pl.BlockSpec((1, Cout, Kd), lambda r, i: (r, 0, 0)),
                pl.BlockSpec((1, Kd, tm), lambda r, i: (r, 0, i)),
                pl.BlockSpec((Cout, 1), lambda r, i: (0, 0)),
            ],
            out_specs=pl.BlockSpec((1, Cout, tm), lambda r, i: (r, 0, i)),
        ),
        compiler_params=pltpu.CompilerParams(
            dimension_semantics=("parallel", "parallel"),
            vmem_limit_bytes=32 * 1024 * 1024,
        ),
        cost_estimate=pl.CostEstimate(
            flops=flops, transcendentals=0, bytes_accessed=bytes_accessed),
    )(w_t, cols_t, bias_col)


# ----------------------------------------------------------------------------
# EqualConvTranspose2d forward (PyTorch semantics, NCHW in / NCHW out).
# ----------------------------------------------------------------------------
def equal_conv_transpose2d(x_nchw, weight, bias, stride, padding):
    """x_nchw: (N, Cin, H, W); weight: (Cin, Cout, K, K) (PyTorch conv_transpose layout);
    bias: (Cout,) or None."""
    N, Cin, H, W = x_nchw.shape
    Cin_w, Cout, K, K2 = weight.shape
    assert Cin == Cin_w and K == K2
    s = int(stride)
    p = int(padding)
    scale = 1.0 / math.sqrt(Cin * K * K)
    w_s = weight.astype(jnp.float32) * scale

    Hout = (H - 1) * s - 2 * p + K
    Wout = (W - 1) * s - 2 * p + K
    assert Hout > 0 and Wout > 0

    # Boundary pad of the UNDILATED input; ceil(K/s) is always enough on each side.
    Tpad = (K + s - 1) // s
    x_p = jnp.pad(x_nchw.astype(jnp.float32),
                  ((0, 0), (0, 0), (Tpad, Tpad), (Tpad, Tpad)))

    # Per-dimension residue geometry: outputs with (o + p) % s == r are a stride-1 conv
    # of x with taps k = r + s*j, reading x at index q - j where q = (o + p - r) // s.
    def _geom(r, out_size):
        taps = list(range(r, K, s))
        q_min = -((r - p) // s)                       # = ceil((p - r) / s), always >= 0
        q_max = (out_size - 1 + p - r) // s
        return taps, q_min, q_max - q_min + 1

    residues = []
    for rh in range(s):
        taps_h, qh_min, nqh = _geom(rh, Hout)
        if nqh <= 0:
            continue
        for rw in range(s):
            taps_w, qw_min, nqw = _geom(rw, Wout)
            if nqw <= 0:
                continue
            residues.append((rh, rw, taps_h, taps_w, qh_min, qw_min, nqh, nqw))

    Kd_max = max([len(th) * len(tw) * Cin for _, _, th, tw, _, _, _, _ in residues] + [1])
    M_max = max(N * nqh * nqw for *_, nqh, nqw in residues)
    Mp = _round_up(M_max, 128)

    cols_list, w_list = [], []
    for (rh, rw, taps_h, taps_w, qh_min, qw_min, nqh, nqw) in residues:
        Th, Tw = len(taps_h), len(taps_w)
        M_r = N * nqh * nqw
        if Th * Tw > 0:
            # im2col over the undilated, boundary-padded input (pure glue, no zeros dilated in).
            patches = []
            for jh in range(Th):
                hs = qh_min - jh + Tpad
                for jw in range(Tw):
                    ws = qw_min - jw + Tpad
                    patches.append(x_p[:, :, hs:hs + nqh, ws:ws + nqw])   # (N, Cin, nqh, nqw)
            cols_r = jnp.stack(patches, axis=0)                            # (T, N, Cin, nqh, nqw)
            cols_r = cols_r.transpose(0, 2, 1, 3, 4).reshape(Th * Tw * Cin, M_r)
            # Sub-kernel: W[ci, co, rh::s, rw::s] * scale, contraction order (jh, jw, ci).
            w_r = w_s[:, :, rh::s, rw::s].transpose(1, 2, 3, 0).reshape(Cout, Th * Tw * Cin)
        else:
            cols_r = jnp.zeros((0, M_r), jnp.float32)
            w_r = jnp.zeros((Cout, 0), jnp.float32)
        cols_r = jnp.pad(cols_r, ((0, Kd_max - cols_r.shape[0]), (0, Mp - M_r)))
        w_r = jnp.pad(w_r, ((0, 0), (0, Kd_max - w_r.shape[1])))
        cols_list.append(cols_r)
        w_list.append(w_r)

    cols_t = jnp.stack(cols_list, axis=0)        # (R, Kd_max, Mp)   M lane-dense
    w_t = jnp.stack(w_list, axis=0)              # (R, Cout, Kd_max)

    if bias is None:
        b_col = jnp.zeros((Cout, 1), jnp.float32)
    else:
        b_col = bias.astype(jnp.float32).reshape(Cout, 1)

    out_t = _grouped_matmul_pallas(w_t, cols_t, b_col)   # (R, Cout, Mp)  <- Pallas hot path

    # Interleave the residue outputs back into the NCHW result (strided scatter, glue).
    out = jnp.zeros((N, Cout, Hout, Wout), jnp.float32)
    for idx, (rh, rw, _, _, qh_min, qw_min, nqh, nqw) in enumerate(residues):
        M_r = N * nqh * nqw
        o_r = out_t[idx, :, :M_r].reshape(Cout, N, nqh, nqw).transpose(1, 0, 2, 3)
        h0 = qh_min * s + rh - p
        w0 = qw_min * s + rw - p
        out = out.at[:, :, h0:h0 + s * nqh:s, w0:w0 + s * nqw:s].set(o_r)
    return out.astype(x_nchw.dtype)


# ----------------------------------------------------------------------------
# Pure-JAX reference (matches F.conv_transpose2d semantics)
# ----------------------------------------------------------------------------
def _reference(x_nchw, weight, bias, stride, padding):
    Cin, Cout, K, _ = weight.shape
    scale = 1.0 / math.sqrt(Cin * K * K)
    w = weight * scale
    w_oihw = jnp.transpose(w, (1, 0, 2, 3))[:, :, ::-1, ::-1]
    out = jax.lax.conv_general_dilated(
        x_nchw, w_oihw,
        window_strides=(1, 1),
        padding=[(K - 1 - padding, K - 1 - padding)] * 2,
        lhs_dilation=(stride, stride),
        dimension_numbers=("NCHW", "OIHW", "NCHW"),
    )
    if bias is not None:
        out = out + bias[None, :, None, None]
    return out


def _run_case(key, N, Cin, Cout, K, stride, padding, H, W):
    kx, kw = jax.random.split(key)
    x = jax.random.normal(kx, (N, Cin, H, W), dtype=jnp.float32)
    weight = jax.random.normal(kw, (Cin, Cout, K, K), dtype=jnp.float32)  # torch.randn equivalent
    bias = jnp.zeros((Cout,), dtype=jnp.float32)                           # torch.zeros equivalent

    out = equal_conv_transpose2d(x, weight, bias, stride, padding)
    out = jax.block_until_ready(out)

    ref = _reference(x, weight, bias, stride, padding)
    Hout = (H - 1) * stride - 2 * padding + K
    Wout = (W - 1) * stride - 2 * padding + K
    assert out.shape == (N, Cout, Hout, Wout), out.shape
    np.testing.assert_allclose(np.asarray(out), np.asarray(ref), rtol=1e-4, atol=1e-4)


if __name__ == "__main__":
    key = jax.random.PRNGKey(0)
    k1, k2, k3 = jax.random.split(key, 3)
    # Module config: EqualConvTranspose2d(in_channel=4, out_channel=8, kernel_size=4,
    #                                     stride=2, padding=1, bias=True)
    _run_case(k1, N=2, Cin=4, Cout=8, K=4, stride=2, padding=1, H=16, W=16)
    # Extra coverage: stride=1 (single residue) and heterogeneous residues (K % s != 0).
    _run_case(k2, N=1, Cin=4, Cout=8, K=3, stride=1, padding=1, H=8, W=8)
    _run_case(k3, N=1, Cin=4, Cout=8, K=5, stride=3, padding=2, H=6, W=6)
    print("KERNEL_OK")
</pallas_src>

<mosaic_0001>
module attributes {stable_mosaic.version = 11 : i64} {
  func.func @_grouped_matmul_kernel(%arg0: i32, %arg1: i32, %arg2: memref<1x8x16xf32, #tpu.memory_space<vmem>>, %arg3: memref<1x16x512xf32, #tpu.memory_space<vmem>>, %arg4: memref<8x1xf32, #tpu.memory_space<vmem>>, %arg5: memref<1x8x512xf32, #tpu.memory_space<vmem>>) attributes {dimension_semantics = [#tpu.dimension_semantics<parallel>, #tpu.dimension_semantics<parallel>], iteration_bounds = array<i64: 4, 1>, scalar_prefetch = 0 : i64, scratch_operands = 0 : i64, tpu.core_type = #tpu.core_type<tc>, window_params = [{transform_indices = @transform_0, window_bounds = array<i64: 1, 8, 16>}, {transform_indices = @transform_1, window_bounds = array<i64: 1, 16, 512>}, {pipeline_mode = #tpu.pipeline_mode<synchronous>, transform_indices = @transform_2, window_bounds = array<i64: 8, 1>}, {transform_indices = @transform_3, window_bounds = array<i64: 1, 8, 512>}]} {
    %c0 = arith.constant 0 : index
    %c0_0 = arith.constant 0 : index
    %c0_1 = arith.constant 0 : index
    %0 = vector.load %arg2[%c0, %c0_0, %c0_1] : memref<1x8x16xf32, #tpu.memory_space<vmem>>, vector<1x8x16xf32>
    %1 = vector.shape_cast %0 : vector<1x8x16xf32> to vector<8x16xf32>
    %c0_2 = arith.constant 0 : index
    %c0_3 = arith.constant 0 : index
    %c0_4 = arith.constant 0 : index
    %2 = vector.load %arg3[%c0_2, %c0_3, %c0_4] : memref<1x16x512xf32, #tpu.memory_space<vmem>>, vector<1x16x512xf32>
    %3 = vector.shape_cast %2 : vector<1x16x512xf32> to vector<16x512xf32>
    %cst = arith.constant dense<0.000000e+00> : vector<8x512xf32>
    %4 = tpu.matmul %1, %3, %cst {dimension_numbers = #tpu.dot_dimension_numbers<[1], [0], [0], [1], [0, 0, 1, 1], [], []>} : vector<8x16xf32>, vector<16x512xf32>, vector<8x512xf32> -> vector<8x512xf32>
    %c0_5 = arith.constant 0 : index
    %c0_6 = arith.constant 0 : index
    %5 = vector.load %arg4[%c0_5, %c0_6] : memref<8x1xf32, #tpu.memory_space<vmem>>, vector<8x1xf32>
    %6 = vector.broadcast %5 : vector<8x1xf32> to vector<8x512xf32>
    %7 = arith.addf %4, %6 : vector<8x512xf32>
    %c0_7 = arith.constant 0 : index
    %c0_8 = arith.constant 0 : index
    %c0_9 = arith.constant 0 : index
    %8 = vector.load %arg5[%c0_7, %c0_8, %c0_9] : memref<1x8x512xf32, #tpu.memory_space<vmem>>, vector<1x8x512xf32>
    %9 = vector.shape_cast %8 : vector<1x8x512xf32> to vector<8x512xf32>
    %10 = vector.shape_cast %7 : vector<8x512xf32> to vector<1x8x512xf32>
    tpu.vector_store %arg5[%c0_7, %c0_8, %c0_9], %10 {strides = array<i32>} : memref<1x8x512xf32, #tpu.memory_space<vmem>>, vector<1x8x512xf32>,
    return
  }
  func.func @transform_0(%arg0: i32, %arg1: i32) -> (i32, i32, i32) {
    %c0_i32 = arith.constant 0 : i32
    %c0_i32_0 = arith.constant 0 : i32
    %c0_i32_1 = arith.constant 0 : i32
    return %arg0, %c0_i32, %c0_i32_0 : i32, i32, i32
  }
  func.func @transform_1(%arg0: i32, %arg1: i32) -> (i32, i32, i32) {
    %c0_i32 = arith.constant 0 : i32
    %c0_i32_0 = arith.constant 0 : i32
    return %arg0, %c0_i32, %arg1 : i32, i32, i32
  }
  func.func @transform_2(%arg0: i32, %arg1: i32) -> (i32, i32) {
    %c0_i32 = arith.constant 0 : i32
    %c0_i32_0 = arith.constant 0 : i32
    %c0_i32_1 = arith.constant 0 : i32
    return %c0_i32, %c0_i32_0 : i32, i32
  }
  func.func @transform_3(%arg0: i32, %arg1: i32) -> (i32, i32, i32) {
    %c0_i32 = arith.constant 0 : i32
    %c0_i32_0 = arith.constant 0 : i32
    return %arg0, %c0_i32, %arg1 : i32, i32, i32
  }
}

</mosaic_0001>

<bundles_post_ra>
// kernel: tpu_custom_call.1
= control target key start
LH: loop header
LB: loop body
LE: loop exit
PB: predicated region body
PF: predicated region fallthrough
CT: control target
= control target key end

     0   :  { %8 = vsyncpa [#allocation3], 0  ;;  %s970_s0 = inlined_call_operand.hbm [shape: f32[4,8,16], index: 0, kind: input, shape index: {}]   ;;  %s971_s1 = inlined_call_operand.hbm [shape: f32[4,16,512], index: 1, kind: input, shape index: {}]   ;;  %s972_s2 = inlined_call_operand.vmem [shape: f32[8,1], index: 2, kind: input, shape index: {}]   ;;  %s973_s3 = inlined_call_operand.hbm [shape: f32[4,8,512], index: 3, kind: output, shape index: {}]  }
   0x1   :  { %10 = vsyncpa [#allocation3 + $0x1], 0 }
   0x2   :  { %11 = vsyncpa [#allocation6], 0 }
   0x3   :  { %13 = vsyncpa [#allocation6 + $0x1], 0 }
   0x4   :  { %14 = vsyncpa [#allocation4], 0 }
   0x5   :  { %16 = vsyncpa [#allocation4 + $0x1], 0  ;;  %s798_s12 = smov 0   ;;  %s800_s13 = smov 0  }
   0x6   :  { %s802_s14 = smov 0   ;;  %s804_s15 = smov 0  }
   0x7   :  { %s806_s16 = smov 0   ;;  %s808_s17 = smov 0  }
   0x8 LB: > { %s535_s18 = sadd.s32 4294967295, %s769_s17   ;;  %s536_s19 = sadd.s32 4294967294, %s769_s17   ;;  %s769_s17 = sphi %s808_s17, %s22_s17   ;;  %s765_s16 = sphi %s806_s16, %s984_s16   ;;  %s761_s15 = sphi %s804_s15, %s983_s15   ;;  %s757_s14 = sphi %s802_s14, %s982_s14   ;;  %s753_s13 = sphi %s800_s13, %s981_s13   ;;  %s749_s12 = sphi %s798_s12, %s980_s12  }
   0x9   : > { %s34_s20 = sadd.s32 1, %s765_s16  ;;  %s41_s21 = sadd.s32 1, %s757_s14 }
   0xa   : > { %p36_p0 = scmp.ge.s32.totalorder %s34_s20, 4  ;;  %p48_p1 = scmp.ne.s32.totalorder %s757_s14, %s753_s13 }
   0xb   : > { %p49_p2 = scmp.eq.s32.totalorder %s769_s17, 0  ;;  %p54_p3 = scmp.ne.s32.totalorder %s753_s13, %s749_s12 }
   0xc   : > { %s986_s20 = smov (%p36_p0, %s34_s20), 0  ;;  %p55_p5 = scmp.eq.s32.totalorder %s535_s18, 0 }
   0xd   : > { %p839_p4 = por %p49_p2, %p48_p1  ;;  %s38_s23 = ssub.s32 %s765_s16, %s986_s20 }
   0xe   : > { %p129_p6 = scmp.eq.s32.totalorder %s535_s18, 3  ;;  %p39_p7 = scmp.eq.s32.totalorder %s38_s23, 0 }
   0xf   : > { %p845_p8 = por %p55_p5, %p54_p3  ;;  %p135_p10 = scmp.eq.s32.totalorder %s536_s19, 3 }
  0x10   : > { %p849_p9 = por %p129_p6, %p48_p1  ;;  %p574_p12 = scmp.lt.s32.totalorder %s769_s17, 4 }
  0x11   : > { %s854_s26 = scalar_select %p39_p7, %s757_s14, %s41_s21  }
  0x12   : > { %p856_p11 = por %p135_p10, %p54_p3  ;;  %s862_s28 = sand.u32 1, %s757_s14  }
  0x13   : > { %s539_s29 = sshll.u32 %s862_s28, 3  ;;  %s540_s30 = sshll.u32 %s765_s16, 7 }
  0x14   : > { %s167_s6 = scalar_lea.hbm %s970_s0, %s540_s30  ;;  %s162_s7 = scalar_lea.vmem [#allocation2], %s539_s29 }
  0x15   : > { %s169_s8 = sshll.u32 %s162_s7, 4  ;;  %p871_p13 = pnand %p574_p12, %p839_p4  ;;  %s170_s8 = int_to_ptr.vmem [resolvable:$true] %s169_s8 }
  0x16   : > { %p544_p0 = scmp.ge.s32.totalorder %s769_s17, 1  ;;  %p197_p1 = scmp.lt.s32.totalorder %s769_s17, 5 }
  0x17   : > { %s159_s10 = scalar_lea.sflag [#allocation3], %s862_s28  ;;  %p631_p2 = pneg %p871_p13 }
  0x18   : > { %s642_s11 = scalar_lea.vmem %s170_s8, 128  ;;  %s771_s18 = smov [#allocation2]  }
  0x19   : > { %p643_p3 = scmp.ne.s32.totalorder %s170_s8, %s642_s11  ;;  %s647_s19 = sshll.u32 %s771_s18, 4  ;;  %s648_s19 = int_to_ptr.vmem [resolvable:$false] %s647_s19 }
  0x1a   : > { %s649_s21 = scalar_lea.vmem %s648_s19, 256  ;;  %p650_p4 = scmp.lt.s32.totalorder %s170_s8, %s648_s19 }
  0x1b   : > { %p645_p5 = pnand %p643_p3, %p631_p2  ;;  %p651_p7 = scmp.lt.s32.totalorder %s649_s21, %s642_s11 }
  0x1d   : > { %p646_p6 = pneg %p645_p5  ;;  %p652_p10 = por %p651_p7, %p650_p4 }
  0x1f   : > { %p653_p12 = pnand %p652_p10, %p646_p6 }
  0x21   : > { %656 = shalt.err (!%p653_p12)
}
  0x22   : > { %566 = dma.hbm_to_vmem [thread:$0]  (!%p871_p13), %s167_s6, 128, %s170_s8, %s159_s10  }
  0x23   : > { %p889_p3 = pnand %p544_p0, %p197_p1  ;;  %s541_s23 = sshll.u32 %s862_s28, 6 }
  0x24   : > { %s555_s29 = sshll.u32 %s765_s16, 10  ;;  %s180_s7 = scalar_lea.vmem [#allocation5], %s541_s23 }
  0x25   : > { %s188_s5 = scalar_lea.hbm %s971_s1, %s555_s29  ;;  %s189_s11 = sshll.u32 %s180_s7, 4  ;;  %s190_s11 = int_to_ptr.vmem [resolvable:$true] %s189_s11 }
  0x26   : > { %s177_s18 = scalar_lea.sflag [#allocation6], %s862_s28  ;;  %s670_s19 = scalar_lea.vmem %s190_s11, 1024 }
  0x27   : > { %p671_p5 = scmp.ne.s32.totalorder %s190_s11, %s670_s19  ;;  %s772_s6 = smov [#allocation5]  }
  0x28   : > { %s675_s8 = sshll.u32 %s772_s6, 4  ;;  %s676_s8 = int_to_ptr.vmem [resolvable:$false] %s675_s8 }
  0x29   : > { %p673_p6 = pnand %p671_p5, %p631_p2  ;;  %s677_s10 = scalar_lea.vmem %s676_s8, 2048 }
  0x2a   : > { %p678_p0 = scmp.lt.s32.totalorder %s190_s11, %s676_s8  ;;  %p679_p1 = scmp.lt.s32.totalorder %s677_s10, %s670_s19 }
  0x2b   : > { %p674_p4 = pneg %p673_p6 }
  0x2c   : > { %p680_p7 = por %p679_p1, %p678_p0 }
  0x2e   : > { %p681_p10 = pnand %p680_p7, %p674_p4 }
  0x30   : > { %684 = shalt.err (!%p681_p10)
}
  0x31   : > { %s773_s21 = smov 512   ;;  %s774_s23 = smov 32  }
  0x32   : > { %569 = dma.hbm_to_vmem [thread:$0]  (!%p871_p13), %s188_s5, 1024, %s190_s11, %s177_s18, %s773_s21, %s773_s21, %s774_s23  }
  0x33   : > { %201 = sbr.rel (%p889_p3) target bundleno = 277 (0x115), region = 32  ;;  %s907_s28 = sand.u32 (!%p889_p3), 1, %s753_s13  }
  0x34   : > { %s545_s29 = sshll.u32 (!%p889_p3), %s907_s28, 3  ;;  %s204_s30 = scalar_lea.sflag (!%p889_p3), [#allocation3], %s907_s28 }
  0x35   : > { %s207_s4 = scalar_lea.vmem (!%p889_p3), [#allocation2], %s545_s29 }
  0x38   : > { %736 = dma.done.wait (%p845_p8), %s204_s30, 128  }
  0x39   : > { %738 = vsyncadd (%p845_p8), %s204_s30, 4294967168  ;;  %s546_s9 = sshll.u32 %s907_s28, 6  ;;  %s213_s22 = scalar_lea.sflag [#allocation6], %s907_s28 }
  0x3a   : > { %s216_s5 = scalar_lea.vmem [#allocation5], %s546_s9 }
  0x3b   : > { %740 = dma.done.wait (%p845_p8), %s213_s22, 1024  }
  0x3c   : > { %742 = vsyncadd (%p845_p8), %s213_s22, 4294966272  ;;  %v775_v0 = vmov 0.0   ;;  %v776_v1 = vmov 0   ;;  %v252_v2 = vld [vmem:[%s216_s5 + $0x28] sm:$0xff]  ;;  %v254_v3 = vld [vmem:[%s216_s5 + $0x38] sm:$0xff]  ;;  %vm261_vm0 = vcmask 130048  }
  0x3d   : > { %329 = vmatprep.mubr.f32.mxu0 %v775_v0  ;;  %400 = vmatprep.mubr.f32.mxu1 %v775_v0  ;;  %v251_v4 = vld [vmem:[%s216_s5 + $0x20] sm:$0xff]  ;;  %v253_v5 = vld [vmem:[%s216_s5 + $0x30] sm:$0xff]  ;;  %v248_v6 = vld [vmem:[%s216_s5 + $0x8] sm:$0xff]  ;;  %s547_s11 = sshll.u32 %s907_s28, 5  ;;  %s556_s18 = sshll.u32 %s761_s15, 9 }
  0x3e   : > { %628 = vset.pattern.permute.xlu0 %v776_v1  ;;  %293 = vmatprep.subr.mxu0 %v252_v2  ;;  %v250_v7 = vld [vmem:[%s216_s5 + $0x18] sm:$0xff]  ;;  %v247_v8 = vld [vmem:[%s216_s5] sm:$0xff]  ;;  %v249_v9 = vld [vmem:[%s216_s5 + $0x10] sm:$0xff]  ;;  %s243_s19 = scalar_lea.vmem [#allocation7], %s547_s11  ;;  %s929_s21 = scalar_lea.hbm %s973_s3, %s556_s18 }
  0x3f   : > { %364 = vmatprep.subr.mxu1 %v254_v3  ;;  %294 = vmatpush1.msra.mxu0 %v251_v4  ;;  %v246_v10 = vld [vmem:[%s207_s4] sm:$0xff]  ;;  %s428_s6 = sshll.u32 %s243_s19, 4  ;;  %s412_s15 = scalar_lea.sflag [#allocation4], %s907_s28  ;;  %s429_s6 = int_to_ptr.vmem [resolvable:$true] %s428_s6 }
  0x40   : > { %365 = vmatpush1.msra.mxu1 %v253_v5  ;;  %295 = vmatprep.subr.mxu0 %v248_v6  ;;  %v255_v11 = vld [vmem:[%s972_s2] sm:$0xff]  ;;  %s685_s23 = scalar_lea.vmem %s429_s6, 512  ;;  %s777_s29 = smov [#allocation7]  }
  0x41   : > { %366 = vmatprep.subr.mxu1 %v250_v7  ;;  %296 = vmatpush1.msra.mxu0 %v247_v8  ;;  %p686_p8 = scmp.ne.s32.totalorder %s429_s6, %s685_s23  ;;  %s689_s30 = sshll.u32 %s777_s29, 4  ;;  %s690_s30 = int_to_ptr.vmem [resolvable:$false] %s689_s30 }
  0x42   : > { %367 = vmatpush1.msra.mxu1 %v249_v9  ;;  %548 = vmatmul.mubr.msk.f32.vlgmr.msra.gmra.mxu0 %vm261_vm0, %v246_v10  ;;  %s691_s4 = scalar_lea.vmem %s690_s30, 1024  ;;  %p692_p12 = scmp.lt.s32.totalorder %s429_s6, %s690_s30 }
  0x43   : > { %549 = vmatmul.mubr.msk.f32.vlgmr.msra.gmra.mxu1 %vm261_vm0, %v246_v10  ;;  %258 = vperm.xlu0 %628, %v255_v11   ;;  %p687_p13 = pnand %p686_p8, %p849_p9  ;;  %p693_p3 = scmp.lt.s32.totalorder %s691_s4, %s685_s23 }
  0x45   : > { %p688_p2 = pneg %p687_p13  ;;  %p694_p5 = por %p693_p3, %p692_p12 }
  0x47   : > { %p695_p6 = pnand %p694_p5, %p688_p2 }
  0xbe   : > { %v259_v12 = vpop.permute.xlu0 %258 }
 0x102   : > { %v331_v13 = vpop.f32.mrf.mxu0 }
 0x103   : > { %v402_v14 = vpop.f32.mrf.mxu1  ;;  %v332_v15 = vadd.f32 %v331_v13, %v259_v12 }
 0x104   : > { %v403_v16 = vadd.f32 %v402_v14, %v259_v12  ;;  %v333_v17 = vpop.f32.mrf.mxu0 }
 0x105   : > { %v404_v18 = vpop.f32.mrf.mxu1  ;;  %407 = vst [vmem:[%s243_s19] sm:$0xff] %v332_v15  ;;  %v334_v19 = vadd.f32 %v333_v17, %v259_v12 }
 0x106   : > { %409 = vst [vmem:[%s243_s19 + $0x10] sm:$0xff] %v403_v16  ;;  %v405_v20 = vadd.f32 %v404_v18, %v259_v12 }
 0x107   : > { %408 = vst [vmem:[%s243_s19 + $0x8] sm:$0xff] %v334_v19 }
 0x108   : > { %410 = vst [vmem:[%s243_s19 + $0x18] sm:$0xff] %v405_v20 }
 0x109   : > { %698 = shalt.err (!%p695_p6)
}
 0x10a   : > { %s699_s9 = scalar_lea.hbm %s929_s21, 512  ;;  %s703_s5 = scalar_lea.hbm %s973_s3, 2048 }
 0x10b   : > { %p700_p4 = scmp.ne.s32.totalorder %s929_s21, %s699_s9  ;;  %p704_p7 = scmp.lt.s32.totalorder %s929_s21, %s973_s3 }
 0x10c   : > { %p705_p10 = scmp.lt.s32.totalorder %s703_s5, %s699_s9 }
 0x10d   : > { %p701_p0 = pnand %p700_p4, %p849_p9 }
 0x10e   : > { %p706_p8 = por %p705_p10, %p704_p7 }
 0x10f   : > { %p702_p1 = pneg %p701_p0 }
 0x111   : > { %p707_p13 = pnand %p706_p8, %p702_p1 }
 0x113   : > { %710 = shalt.err (!%p707_p13)
}
 0x114   : > { %561 = dma.vmem_to_hbm [thread:$0]  (%p849_p9), %s429_s6, 512, %s929_s21, %s412_s15  }
 0x115 PF: > { %p575_p2 = scmp.ge.s32.totalorder %s769_s17, 2  ;;  %s440_s11 = sand.u32 1, %s749_s12  }
 0x116   : > { %s441_s18 = scalar_lea.sflag [#allocation4], %s440_s11 }
 0x117   : > { %p571_p12 = pnand %p575_p2, %p856_p11 }
 0x119   : > { %p572_p3 = pneg %p571_p12 }
 0x11b   : > { %744 = dma.done.wait (%p572_p3), %s441_s18, 512  }
 0x11c   : > { %746 = vsyncadd (%p572_p3), %s441_s18, 4294966784  ;;  %s22_s17 = sadd.s32 1, %s769_s17   ;;  %s980_s12 = smov %s753_s13 }
 0x11d   : > { %p19_p5 = scmp.ge.s32.totalorder %s22_s17, 6   ;;  %s981_s13 = smov %s757_s14 }
 0x11e   : > { %s982_s14 = smov %s854_s26  ;;  %s983_s15 = smov %s765_s16 }
 0x11f   : > { %s984_s16 = smov %s986_s20  ;;  %21 = sbr.rel (!%p19_p5) target bundleno = 8 (0x8), region = 90 }
 0x124   :  { %446 = vsyncpa [#allocation3], 1 }
 0x125   :  { %448 = vsyncpa [#allocation3 + $0x1], 1 }
 0x126   :  { %449 = vsyncpa [#allocation6], 1 }
 0x127   :  { %451 = vsyncpa [#allocation6 + $0x1], 1 }
 0x128   :  { %452 = vsyncpa [#allocation4], 1 }
 0x129   :  { %454 = vsyncpa [#allocation4 + $0x1], 1 }

</bundles_post_ra>
